<compile_context>
chip_gen: v5e
topology: v5e:2x2
jax: 0.10.0
libtpu: 0.0.40
codegen_flags: <defaults>
</compile_context>

<pallas_src>
import functools

import jax
import jax.numpy as jnp
from jax import lax
from jax.experimental import pallas as pl
from jax.experimental.pallas import tpu as pltpu


# ----------------------------------------------------------------------------
# Generation-aware VMEM budget.
# ----------------------------------------------------------------------------
def _vmem_limit_bytes():
    cap = 64 * 1024 * 1024
    try:
        info = pltpu.get_tpu_info()
        cap = int(getattr(info, "vmem_capacity_bytes", cap))
    except Exception:
        pass
    return (cap * 3) // 4        # ~48 MiB on v7x, ~96 MiB on v5e/v6e


_VMEM_LIMIT = _vmem_limit_bytes()


def _round_up(x, m):
    return (x + m - 1) // m * m


# ----------------------------------------------------------------------------
# Fused tiled MLP kernel: y = act_k(... act_0(x @ W0 + b0) ... @ Wk + bk)
# Used for the hoisted LSTM input projection (1 layer, no activation) and for the
# whole FFN head (all layers fused, no HBM round-trip between layers).
# ----------------------------------------------------------------------------
def _mlp_kernel(x_ref, *refs, relu_flags):
    o_ref = refs[-1]
    y = x_ref[...]
    for j, relu in enumerate(relu_flags):
        w = refs[2 * j][...]                           # (K_j, N_j) bf16
        b = refs[2 * j + 1][...]                       # (1, N_j)  f32
        y = jnp.dot(y.astype(w.dtype), w,
                    preferred_element_type=jnp.float32) + b
        if relu:
            y = jnp.maximum(y, 0.0)
    o_ref[...] = y.astype(o_ref.dtype)


def _choose_row_tile(m, budget):
    cap = 512 if budget >= 80 * 1024 * 1024 else 256
    return m if m <= cap else cap


def mlp_forward(x2d, layers, relu_flags, out_dtype=jnp.float32):
    """x2d: (M, K); layers: list of (W (K_j, N_j) bf16, b (1, N_j) f32).

    Returns (M, n_out) in out_dtype. The last layer's output columns are padded to a
    multiple of 128 inside the kernel (lane-dense stores) and sliced off here.
    """
    M, K = x2d.shape
    n_out = layers[-1][0].shape[1]

    # Lane-dense final store.
    n_out_pad = _round_up(n_out, 128)
    if n_out_pad != n_out:
        w_l, b_l = layers[-1]
        w_l = jnp.pad(w_l, ((0, 0), (0, n_out_pad - n_out)))
        b_l = jnp.pad(b_l, ((0, 0), (0, n_out_pad - n_out)))
        layers = list(layers[:-1]) + [(w_l, b_l)]

    tm = _choose_row_tile(M, _VMEM_LIMIT)
    M_pad = _round_up(M, tm)
    if M_pad != M:
        x2d = jnp.pad(x2d, ((0, M_pad - M), (0, 0)))

    in_specs = [pl.BlockSpec((tm, K), lambda i: (i, 0))]
    operands = [x2d]
    flops = 0
    bytes_accessed = x2d.size * x2d.dtype.itemsize
    for (w, b) in layers:
        k_in, k_out = w.shape
        in_specs.append(pl.BlockSpec((k_in, k_out), lambda i: (0, 0)))
        in_specs.append(pl.BlockSpec((1, k_out), lambda i: (0, 0)))
        operands.extend([w, b])
        flops += 2 * M_pad * k_in * k_out
        bytes_accessed += w.size * w.dtype.itemsize + b.size * b.dtype.itemsize
    bytes_accessed += M_pad * n_out_pad * jnp.dtype(out_dtype).itemsize

    y = pl.pallas_call(
        functools.partial(_mlp_kernel, relu_flags=tuple(relu_flags)),
        out_shape=jax.ShapeDtypeStruct((M_pad, n_out_pad), out_dtype),
        grid_spec=pltpu.PrefetchScalarGridSpec(
            num_scalar_prefetch=0,
            grid=(M_pad // tm,),
            in_specs=in_specs,
            out_specs=pl.BlockSpec((tm, n_out_pad), lambda i: (i, 0)),
        ),
        compiler_params=pltpu.CompilerParams(
            dimension_semantics=("parallel",),       # M-tiles shard across TCs (v7x)
            vmem_limit_bytes=_VMEM_LIMIT),
        cost_estimate=pl.CostEstimate(
            flops=int(flops), transcendentals=0,
            bytes_accessed=int(bytes_accessed)),
    )(*operands)
    return y[:M, :n_out]


# ----------------------------------------------------------------------------
# LSTM recurrence kernel (time-major). Per grid step it consumes t_blk timesteps of
# the precomputed input projection (t_blk, N_blk, 4H) and only does h @ W_hh^T per
# step. Gate order inside the 4H axis is (i, f, o, g).
# ----------------------------------------------------------------------------
def _lstm_kernel(gx_ref, whh_ref, out_ref, h_scr, c_scr, *, hidden, t_blk, unroll):
    @pl.when(pl.program_id(1) == 0)          # first time block of this batch block
    def _():
        h_scr[...] = jnp.zeros_like(h_scr)
        c_scr[...] = jnp.zeros_like(c_scr)

    whh = whh_ref[...]                        # (H, 4H) bf16, resident for the block
    h3 = 3 * hidden

    def step(s, carry):
        h, c = carry
        gates = gx_ref[s].astype(jnp.float32) + jnp.dot(
            h.astype(jnp.bfloat16), whh, preferred_element_type=jnp.float32)
        sig = jax.nn.sigmoid(gates[:, :h3])              # (i, f, o) one wide slab
        g = jnp.tanh(gates[:, h3:])
        c = sig[:, hidden:2 * hidden] * c + sig[:, :hidden] * g
        h = sig[:, 2 * hidden:h3] * jnp.tanh(c)
        out_ref[s] = h.astype(out_ref.dtype)             # contiguous time-major tile
        return (h, c)

    h, c = lax.fori_loop(0, t_blk, step, (h_scr[...], c_scr[...]), unroll=unroll)
    h_scr[...] = h
    c_scr[...] = c


def _choose_batch_block(N):
    # Split batch into two blocks (-> two v7x TensorCores) only when each half stays
    # bf16 sublane-aligned (multiple of 16); otherwise keep one block (full dim).
    if N >= 32 and N % 32 == 0:
        return N // 2
    return N


def _choose_t_block(L, nb, hidden, budget):
    # Double-buffered bf16 gates (4H) + h (H) blocks per grid step must fit the budget.
    per_step = max(1, nb * 5 * hidden * 2)
    max_t = max(1, budget // (6 * per_step))
    for t in (64, 32, 16, 8):
        if t <= max_t and L % t == 0:
            return t
    return max(1, min(L, max_t, 32))          # non-divisible L handled via padding


def lstm_recurrence(gates_x, w_hh_t, hidden):
    """gates_x: (L, N, 4H) bf16 time-major (x-projection + summed bias).

    Returns h_seq (L, N, H) bf16 time-major.
    """
    L, N, G = gates_x.shape
    nb = _choose_batch_block(N)
    t_blk = _choose_t_block(L, nb, hidden, _VMEM_LIMIT)
    L_pad = _round_up(L, t_blk)
    if L_pad != L:
        # Trailing padded timesteps never influence the real (causal) outputs.
        gates_x = jnp.pad(gates_x, ((0, L_pad - L), (0, 0), (0, 0)))

    flops = 2 * L_pad * N * hidden * G + 12 * L_pad * N * hidden
    transc = 5 * L_pad * N * hidden
    bytes_accessed = (gates_x.size * gates_x.dtype.itemsize
                      + L_pad * N * hidden * 2 + w_hh_t.size * 2)

    h_seq = pl.pallas_call(
        functools.partial(_lstm_kernel, hidden=hidden, t_blk=t_blk,
                          unroll=min(4, t_blk)),
        out_shape=jax.ShapeDtypeStruct((L_pad, N, hidden), jnp.bfloat16),
        grid_spec=pltpu.PrefetchScalarGridSpec(
            num_scalar_prefetch=0,
            grid=(N // nb, L_pad // t_blk),
            in_specs=[
                pl.BlockSpec((t_blk, nb, G), lambda b, t: (t, b, 0)),   # gates_x
                pl.BlockSpec((hidden, G), lambda b, t: (0, 0)),         # W_hh^T bf16
            ],
            out_specs=pl.BlockSpec((t_blk, nb, hidden), lambda b, t: (t, b, 0)),
            scratch_shapes=[
                pltpu.VMEM((nb, hidden), jnp.float32),   # h carry (per batch block)
                pltpu.VMEM((nb, hidden), jnp.float32),   # c carry (per batch block)
            ],
        ),
        compiler_params=pltpu.CompilerParams(
            dimension_semantics=("parallel", "arbitrary"),  # batch || , time serial
            vmem_limit_bytes=_VMEM_LIMIT),
        cost_estimate=pl.CostEstimate(
            flops=int(flops), transcendentals=int(transc),
            bytes_accessed=int(bytes_accessed)),
    )(gates_x, w_hh_t)
    return h_seq[:L]


# ----------------------------------------------------------------------------
# Parameters. init_params generates PyTorch-convention tensors (gate order i,f,g,o;
# W_ih (4H,d), W_hh (4H,H), separate b_ih/b_hh; Linear weight (out,in)).
# prepare_params permutes gates to (i,f,o,g), transposes, sums biases, casts matmul
# weights to bf16.
# ----------------------------------------------------------------------------
def init_params(key, rnn_in, rnn_hidden, ffn_sizes):
    H = rnn_hidden
    n_ffn = len(ffn_sizes) - 1
    ks = jax.random.split(key, 4 + 2 * n_ffn)
    p = {
        "w_ih": 0.1 * jax.random.normal(ks[0], (4 * H, rnn_in), jnp.float32),
        "w_hh": 0.1 * jax.random.normal(ks[1], (4 * H, H), jnp.float32),
        "b_ih": 0.1 * jax.random.normal(ks[2], (4 * H,), jnp.float32),
        "b_hh": 0.1 * jax.random.normal(ks[3], (4 * H,), jnp.float32),
        "ffn": [],
    }
    for j in range(n_ffn):
        w = 0.1 * jax.random.normal(ks[4 + 2 * j],
                                    (ffn_sizes[j + 1], ffn_sizes[j]), jnp.float32)
        b = 0.1 * jax.random.normal(ks[5 + 2 * j], (ffn_sizes[j + 1],), jnp.float32)
        p["ffn"].append((w, b))
    return p


def _ifgo_to_ifog(a, axis):
    i, f, g, o = jnp.split(a, 4, axis=axis)
    return jnp.concatenate([i, f, o, g], axis=axis)


def prepare_params(pt):
    w_ih_t = _ifgo_to_ifog(pt["w_ih"].T, axis=1).astype(jnp.bfloat16)   # (d, 4H)
    w_hh_t = _ifgo_to_ifog(pt["w_hh"].T, axis=1).astype(jnp.bfloat16)   # (H, 4H)
    b = _ifgo_to_ifog((pt["b_ih"] + pt["b_hh"])[None, :], axis=1)       # (1, 4H)
    ffn = [(w.T.astype(jnp.bfloat16), bb[None, :].astype(jnp.float32))
           for (w, bb) in pt["ffn"]]
    return {"w_ih_t": w_ih_t, "w_hh_t": w_hh_t, "b": b.astype(jnp.float32),
            "ffn": ffn}


# ----------------------------------------------------------------------------
# Forward pass (matches PyTorch RNN.forward: LSTM then FFN over every timestep).
# The final (h_n, c_n) state is discarded by the reference module, so not emitted.
# ----------------------------------------------------------------------------
def rnn_forward(params, x):
    """x: (N, L, rnn_in) f32 -> (N, L, ffn_sizes[-1]) f32."""
    N, L, d = x.shape
    H = params["w_hh_t"].shape[0]

    # Time-major for the recurrence: every timestep is a contiguous tile in VMEM.
    x_tm = jnp.transpose(x, (1, 0, 2))                             # (L, N, d) tiny
    gates_x = mlp_forward(x_tm.reshape(L * N, d),
                          [(params["w_ih_t"], params["b"])], [False],
                          out_dtype=jnp.bfloat16)
    gates_x = gates_x.reshape(L, N, 4 * H)

    h_seq = lstm_recurrence(gates_x, params["w_hh_t"], H)          # (L, N, H) bf16

    n = len(params["ffn"])
    relu_flags = [j < n - 1 for j in range(n)]
    y = mlp_forward(h_seq.reshape(L * N, H), params["ffn"], relu_flags,
                    out_dtype=jnp.float32)                         # (L*N, out)
    y = y.reshape(L, N, -1)
    return jnp.transpose(y, (1, 0, 2))                             # (N, L, out)


# ----------------------------------------------------------------------------
# Pure-JAX f32 reference in the original PyTorch layout / gate order.
# ----------------------------------------------------------------------------
def rnn_forward_ref(pt, x):
    H = pt["w_hh"].shape[1]
    w_ih_t, w_hh_t = pt["w_ih"].T, pt["w_hh"].T
    b = (pt["b_ih"] + pt["b_hh"])[None, :]

    def step(carry, x_t):
        h, c = carry
        gates = x_t @ w_ih_t + h @ w_hh_t + b
        i = jax.nn.sigmoid(gates[:, 0 * H:1 * H])
        f = jax.nn.sigmoid(gates[:, 1 * H:2 * H])
        g = jnp.tanh(gates[:, 2 * H:3 * H])
        o = jax.nn.sigmoid(gates[:, 3 * H:4 * H])
        c = f * c + i * g
        h = o * jnp.tanh(c)
        return (h, c), h

    N, L, _ = x.shape
    h0 = jnp.zeros((N, H), jnp.float32)
    _, hs = jax.lax.scan(step, (h0, h0), jnp.transpose(x, (1, 0, 2)))
    y = jnp.transpose(hs, (1, 0, 2)).reshape(N * L, H)
    n = len(pt["ffn"])
    for j, (w, bb) in enumerate(pt["ffn"]):
        y = y @ w.T + bb[None, :]
        if j < n - 1:
            y = jnp.maximum(y, 0.0)
    return y.reshape(N, L, -1)


if __name__ == "__main__":
    rnn_in, rnn_hidden = 4, 32
    ffn_sizes = (32, 16, 8)
    N, L = 2, 8

    key = jax.random.PRNGKey(0)
    k_p, k_x = jax.random.split(key)
    pt_params = init_params(k_p, rnn_in, rnn_hidden, ffn_sizes)
    params = prepare_params(pt_params)
    x = jax.random.normal(k_x, (N, L, rnn_in), jnp.float32)

    out = rnn_forward(params, x)
    jax.block_until_ready(out)

    ref = rnn_forward_ref(pt_params, x)
    assert out.shape == (N, L, ffn_sizes[-1])
    # Tolerance accounts for bf16 matmul operands plus bf16 HBM storage of
    # gates_x / h_seq (f32 accumulation and f32 h/c carry inside the kernels).
    assert jnp.allclose(out, ref, atol=3e-2, rtol=3e-2), \
        float(jnp.max(jnp.abs(out - ref)))

    print("KERNEL_OK")
</pallas_src>

<mosaic_0001>
module attributes {stable_mosaic.version = 11 : i64} {
  func.func @_mlp_kernel(%arg0: i32, %arg1: memref<16x4xf32, #tpu.memory_space<vmem>>, %arg2: memref<4x128xbf16, #tpu.memory_space<vmem>>, %arg3: memref<1x128xf32, #tpu.memory_space<vmem>>, %arg4: memref<16x128xbf16, #tpu.memory_space<vmem>>) attributes {dimension_semantics = [#tpu.dimension_semantics<parallel>], iteration_bounds = array<i64: 1>, scalar_prefetch = 0 : i64, scratch_operands = 0 : i64, tpu.core_type = #tpu.core_type<tc>, window_params = [{transform_indices = @transform_0, window_bounds = array<i64: 16, 4>}, {pipeline_mode = #tpu.pipeline_mode<synchronous>, transform_indices = @transform_1, window_bounds = array<i64: 4, 128>}, {pipeline_mode = #tpu.pipeline_mode<synchronous>, transform_indices = @transform_2, window_bounds = array<i64: 1, 128>}, {transform_indices = @transform_3, window_bounds = array<i64: 16, 128>}]} {
    %c0 = arith.constant 0 : index
    %c0_0 = arith.constant 0 : index
    %0 = vector.load %arg1[%c0, %c0_0] : memref<16x4xf32, #tpu.memory_space<vmem>>, vector<16x4xf32>
    %c0_1 = arith.constant 0 : index
    %c0_2 = arith.constant 0 : index
    %1 = vector.load %arg2[%c0_1, %c0_2] : memref<4x128xbf16, #tpu.memory_space<vmem>>, vector<4x128xbf16>
    %c0_3 = arith.constant 0 : index
    %c0_4 = arith.constant 0 : index
    %2 = vector.load %arg3[%c0_3, %c0_4] : memref<1x128xf32, #tpu.memory_space<vmem>>, vector<1x128xf32>
    %3 = arith.truncf %0 : vector<16x4xf32> to vector<16x4xbf16>
    %cst = arith.constant dense<0.000000e+00> : vector<16x128xf32>
    %4 = tpu.matmul %3, %1, %cst {dimension_numbers = #tpu.dot_dimension_numbers<[1], [0], [0], [1], [0, 0, 1, 1], [], []>} : vector<16x4xbf16>, vector<4x128xbf16>, vector<16x128xf32> -> vector<16x128xf32>
    %5 = vector.broadcast %2 : vector<1x128xf32> to vector<16x128xf32>
    %6 = arith.addf %4, %5 : vector<16x128xf32>
    %7 = arith.truncf %6 : vector<16x128xf32> to vector<16x128xbf16>
    %c0_5 = arith.constant 0 : index
    %c0_6 = arith.constant 0 : index
    %8 = vector.load %arg4[%c0_5, %c0_6] : memref<16x128xbf16, #tpu.memory_space<vmem>>, vector<16x128xbf16>
    tpu.vector_store %arg4[%c0_5, %c0_6], %7 {strides = array<i32>} : memref<16x128xbf16, #tpu.memory_space<vmem>>, vector<16x128xbf16>,
    return
  }
  func.func @transform_0(%arg0: i32) -> (i32, i32) {
    %c0_i32 = arith.constant 0 : i32
    %c0_i32_0 = arith.constant 0 : i32
    return %arg0, %c0_i32 : i32, i32
  }
  func.func @transform_1(%arg0: i32) -> (i32, i32) {
    %c0_i32 = arith.constant 0 : i32
    %c0_i32_0 = arith.constant 0 : i32
    %c0_i32_1 = arith.constant 0 : i32
    return %c0_i32, %c0_i32_0 : i32, i32
  }
  func.func @transform_2(%arg0: i32) -> (i32, i32) {
    %c0_i32 = arith.constant 0 : i32
    %c0_i32_0 = arith.constant 0 : i32
    %c0_i32_1 = arith.constant 0 : i32
    return %c0_i32, %c0_i32_0 : i32, i32
  }
  func.func @transform_3(%arg0: i32) -> (i32, i32) {
    %c0_i32 = arith.constant 0 : i32
    %c0_i32_0 = arith.constant 0 : i32
    return %arg0, %c0_i32 : i32, i32
  }
}

</mosaic_0001>

<bundles_post_ra>
// kernel: tpu_custom_call.1
= control target key start
LH: loop header
LB: loop body
LE: loop exit
PB: predicated region body
PF: predicated region fallthrough
CT: control target
= control target key end

     0   :  { %vm28_vm0 = vcmask 1041408   ;;  %vm24_vm1 = vcmask 31744   ;;  %s142_s0 = inlined_call_operand.vmem [shape: f32[16,4], index: 0, kind: input, shape index: {}]   ;;  %s143_s1 = inlined_call_operand.vmem [shape: bf16[4,128], index: 1, kind: input, shape index: {}]   ;;  %s144_s2 = inlined_call_operand.vmem [shape: f32[1,128], index: 2, kind: input, shape index: {}]   ;;  %s145_s3 = inlined_call_operand.hbm [shape: bf16[16,128], index: 3, kind: output, shape index: {}]  }
   0x1   :  { %v18_v0 = vld [vmem:[%s143_s1] sm:$0x3]  ;;  %v17_v2 = vld [vmem:[%s142_s0 + $0x8] sm:$0xff] }
   0x2   :  { %v16_v1 = vld [vmem:[%s142_s0] sm:$0xff]  ;;  %v30_v3 = vsel %vm28_vm0, %v18_v0, 0 }
   0x3   :  { %v20_v4 = vpack.c.bf16 %v17_v2, %v16_v1  ;;  %39 = vmatpush.bf16.msra.mxu0 %v30_v3 }
   0x4   :  { %8 = vsyncpa [#allocation3], 0  ;;  %v77_v6 = vld [vmem:[%s144_s2] ss:$0 sm:$0xff]  ;;  %s104_s1 = smov [#allocation2]   ;;  %s56_s23 = sshll.u32 %s145_s3, 4  ;;  %s57_s23 = int_to_ptr.hbm [resolvable:$true] %s56_s23 }
   0x5   :  { %s54_s20 = sshll.u32 %s104_s1, 4  ;;  %s105_s0 = smov 64   ;;  %s55_s20 = int_to_ptr.vmem [resolvable:$true] %s54_s20 }
   0x6   :  { %68 = vmatmul.msk.bf16.vlgmr.msra.gmra.mxu0 %vm24_vm1, %v20_v4  ;;  %s106_s24 = smov 4  }
  0x83   :  { %v41_v5 = vpop.f32.mrf.mxu0 }
  0x84   :  { %v42_v8 = vadd.f32 %v77_v6, %v41_v5 }
  0x8b   :  { %v43_v7 = vpop.f32.mrf.mxu0 }
  0x8c   :  { %v44_v9 = vadd.f32 %v77_v6, %v43_v7 }
  0x8e   :  { %v72_v10 = vpack.c.bf16 %v44_v9, %v42_v8 }
  0x90   :  { %73 = vst [vmem:[#allocation2] sm:$0xff] %v72_v10  }
  0x91   :  { %62 = dma.vmem_to_hbm [thread:$0]  %s55_s20, 128, %s57_s23, [#allocation3], %s105_s0, %s105_s0, %s106_s24  }
  0x92   :  { %102 = dma.done.wait [#allocation3], 128  }
  0x93   :  { %103 = vsyncadd [#allocation3], 4294967168 }
  0x94   :  { %67 = vsyncpa [#allocation3], 1 }

</bundles_post_ra>
